<compile_context>
chip_gen: v5e
topology: v5e:2x2
jax: 0.10.0
libtpu: 0.0.40
codegen_flags: <defaults>
</compile_context>

<pallas_src>
import math

import jax
import jax.numpy as jnp
from jax import lax
from jax.experimental import pallas as pl
from jax.experimental.pallas import tpu as pltpu


# ----------------------------------------------------------------------------
# Tile selection
# ----------------------------------------------------------------------------
def _largest_divisor_tile(dim, cap, align):
    """Largest multiple of `align` that divides `dim` and is <= cap, else None."""
    t = min(cap, dim)
    t = (t // align) * align
    while t >= align:
        if dim % t == 0:
            return t
        t -= align
    return None


def _pick_tn(d):
    """Feature tile: take the whole d_model when it is small enough (drops the
    feature grid axis entirely); otherwise prefer 256-multiples (v6e/v7x MXU),
    then 128 (lane width), else the full dim."""
    if d <= 1024:
        return d
    for align in (256, 128):
        t = _largest_divisor_tile(d, 1024, align)
        if t is not None:
            return t
    return d


# ----------------------------------------------------------------------------
# Fused circular-conv (3 matmuls + pltpu.roll) + positional-embedding kernel
# ----------------------------------------------------------------------------
def _token_pos_embed_kernel(x_ref, w_ref, pe_ref, o_ref):
    # x_ref : (1, L, C)     raw input rows for one batch (full sequence)
    # w_ref : (3, C, tn)    w[k] = conv_w[:, :, k].T slice
    # pe_ref: (L, tn)       positional-embedding tile (batch-invariant)
    # o_ref : (1, L, tn)
    x = x_ref[0]                               # (L, C)
    L = x.shape[0]
    # Circular shifts along the sequence (sublane) axis via the XLU.
    x_prev = pltpu.roll(x, 1, 0)               # row l <- x[l-1]  (circular)
    x_next = pltpu.roll(x, L - 1, 0)           # row l <- x[l+1]  (circular)

    acc = jnp.dot(x_prev, w_ref[0], preferred_element_type=jnp.float32)
    acc = acc + jnp.dot(x,      w_ref[1], preferred_element_type=jnp.float32)
    acc = acc + jnp.dot(x_next, w_ref[2], preferred_element_type=jnp.float32)

    o_ref[0] = (acc + pe_ref[...]).astype(o_ref.dtype)


def data_embedding_wo_time(x, conv_w, pe):
    """x: (B, L, c_in) f32, conv_w: (d_model, c_in, 3), pe: (L, d_model)
    -> (B, L, d_model) = CircularConv1d(x) + pe   (dropout = identity)."""
    B, L, C = x.shape
    D = conv_w.shape[0]

    # w[k, c, d] = conv_w[d, c, k]  =>  y_l = x_{l-1} @ w[0] + x_l @ w[1] + x_{l+1} @ w[2]
    w = jnp.transpose(conv_w, (2, 1, 0)).astype(jnp.float32)      # (3, C, D)

    tn = _pick_tn(D)
    # Batch is the INNERMOST grid axis: pe / w block indices are constant across
    # it, so Pallas skips their re-DMA and they stay VMEM-resident.
    grid = (D // tn, B)

    return pl.pallas_call(
        _token_pos_embed_kernel,
        out_shape=jax.ShapeDtypeStruct((B, L, D), jnp.float32),
        grid=grid,
        in_specs=[
            pl.BlockSpec((1, L, C), lambda j, b: (b, 0, 0)),   # x: per-batch, full L
            pl.BlockSpec((3, C, tn), lambda j, b: (0, 0, j)),  # weights: per feature tile
            pl.BlockSpec((L, tn), lambda j, b: (0, j)),        # pe: batch-invariant
        ],
        out_specs=pl.BlockSpec((1, L, tn), lambda j, b: (b, 0, j)),
        compiler_params=pltpu.CompilerParams(
            dimension_semantics=("parallel", "parallel"),
        ),
    )(x.astype(jnp.float32), w, pe.astype(jnp.float32))


# ----------------------------------------------------------------------------
# Parameter construction (matches the PyTorch module's init)
# ----------------------------------------------------------------------------
def positional_encoding(max_len, d_model):
    assert d_model % 2 == 0, "sinusoidal positional embedding requires even d_model"
    position = jnp.arange(max_len, dtype=jnp.float32)[:, None]
    div_term = jnp.exp(
        jnp.arange(0, d_model, 2, dtype=jnp.float32) * (-math.log(10000.0) / d_model))
    ang = position * div_term
    pe = jnp.zeros((max_len, d_model), jnp.float32)
    pe = pe.at[:, 0::2].set(jnp.sin(ang))
    pe = pe.at[:, 1::2].set(jnp.cos(ang))
    return pe


def init_params(key, c_in, d_model, max_len=5000):
    # kaiming_normal_(mode='fan_in', nonlinearity='leaky_relu', a=0.01):
    #   std = sqrt(2 / (1 + a^2)) / sqrt(fan_in),  fan_in = c_in * kernel_size
    a = 0.01
    fan_in = c_in * 3
    std = math.sqrt(2.0 / (1.0 + a * a)) / math.sqrt(fan_in)
    conv_w = std * jax.random.normal(key, (d_model, c_in, 3), jnp.float32)
    return {"conv_w": conv_w, "pe": positional_encoding(max_len, d_model)}


# ----------------------------------------------------------------------------
# Pure-JAX reference (lax.conv, independent of the kernel path)
# ----------------------------------------------------------------------------
def reference_forward(x, conv_w, pe):
    xp = jnp.transpose(x, (0, 2, 1))                                    # (B, C, L)
    xpad = jnp.concatenate([xp[:, :, -1:], xp, xp[:, :, :1]], axis=-1)  # circular pad 1
    y = lax.conv_general_dilated(
        xpad, conv_w, window_strides=(1,), padding="VALID",
        dimension_numbers=("NCH", "OIH", "NCH"))                        # (B, D, L)
    return jnp.transpose(y, (0, 2, 1)) + pe[None, :x.shape[1]]


if __name__ == "__main__":
    B, L, c_in, d_model = 2, 16, 4, 128
    key = jax.random.PRNGKey(0)
    k_params, k_x = jax.random.split(key)

    params = init_params(k_params, c_in, d_model, max_len=64)
    x = jax.random.normal(k_x, (B, L, c_in), jnp.float32)

    # TODO(synk): nn.Dropout(p=0.1) is identity at inference; train-mode dropout
    # (RNG masking via pltpu.prng_*) is not implemented.
    out = data_embedding_wo_time(x, params["conv_w"], params["pe"][:L])
    out = jax.block_until_ready(out)

    assert out.shape == (B, L, d_model), out.shape
    assert bool(jnp.all(jnp.isfinite(out)))

    ref = reference_forward(x, params["conv_w"], params["pe"][:L])
    max_err = float(jnp.max(jnp.abs(out - ref)))
    assert bool(jnp.allclose(out, ref, atol=1e-5, rtol=1e-5)), max_err

    print("KERNEL_OK")
</pallas_src>

<mosaic_0001>
module attributes {stable_mosaic.version = 11 : i64} {
  func.func @_token_pos_embed_kernel(%arg0: i32, %arg1: i32, %arg2: memref<1x16x4xf32, #tpu.memory_space<vmem>>, %arg3: memref<3x4x128xf32, #tpu.memory_space<vmem>>, %arg4: memref<16x128xf32, #tpu.memory_space<vmem>>, %arg5: memref<1x16x128xf32, #tpu.memory_space<vmem>>) attributes {dimension_semantics = [#tpu.dimension_semantics<parallel>, #tpu.dimension_semantics<parallel>], iteration_bounds = array<i64: 1, 2>, scalar_prefetch = 0 : i64, scratch_operands = 0 : i64, tpu.core_type = #tpu.core_type<tc>, window_params = [{transform_indices = @transform_0, window_bounds = array<i64: 1, 16, 4>}, {transform_indices = @transform_1, window_bounds = array<i64: 3, 4, 128>}, {transform_indices = @transform_2, window_bounds = array<i64: 16, 128>}, {transform_indices = @transform_3, window_bounds = array<i64: 1, 16, 128>}]} {
    %c0 = arith.constant 0 : index
    %c0_0 = arith.constant 0 : index
    %c0_1 = arith.constant 0 : index
    %0 = vector.load %arg2[%c0, %c0_0, %c0_1] : memref<1x16x4xf32, #tpu.memory_space<vmem>>, vector<1x16x4xf32>
    %1 = vector.shape_cast %0 : vector<1x16x4xf32> to vector<16x4xf32>
    %c1_i32 = arith.constant 1 : i32
    %2 = tpu.dynamic_rotate %1 by %c1_i32 dim 0 : vector<16x4xf32>, i32 -> vector<16x4xf32>
    %c15_i32 = arith.constant 15 : i32
    %3 = tpu.dynamic_rotate %1 by %c15_i32 dim 0 : vector<16x4xf32>, i32 -> vector<16x4xf32>
    %c0_2 = arith.constant 0 : index
    %c0_3 = arith.constant 0 : index
    %c0_4 = arith.constant 0 : index
    %4 = vector.load %arg3[%c0_2, %c0_3, %c0_4] : memref<3x4x128xf32, #tpu.memory_space<vmem>>, vector<1x4x128xf32>
    %5 = vector.shape_cast %4 : vector<1x4x128xf32> to vector<4x128xf32>
    %cst = arith.constant dense<0.000000e+00> : vector<16x128xf32>
    %6 = tpu.matmul %2, %5, %cst {dimension_numbers = #tpu.dot_dimension_numbers<[1], [0], [0], [1], [0, 0, 1, 1], [], []>} : vector<16x4xf32>, vector<4x128xf32>, vector<16x128xf32> -> vector<16x128xf32>
    %c1 = arith.constant 1 : index
    %c0_5 = arith.constant 0 : index
    %c0_6 = arith.constant 0 : index
    %7 = vector.load %arg3[%c1, %c0_5, %c0_6] : memref<3x4x128xf32, #tpu.memory_space<vmem>>, vector<1x4x128xf32>
    %8 = vector.shape_cast %7 : vector<1x4x128xf32> to vector<4x128xf32>
    %cst_7 = arith.constant dense<0.000000e+00> : vector<16x128xf32>
    %9 = tpu.matmul %1, %8, %cst_7 {dimension_numbers = #tpu.dot_dimension_numbers<[1], [0], [0], [1], [0, 0, 1, 1], [], []>} : vector<16x4xf32>, vector<4x128xf32>, vector<16x128xf32> -> vector<16x128xf32>
    %10 = arith.addf %6, %9 : vector<16x128xf32>
    %c2 = arith.constant 2 : index
    %c0_8 = arith.constant 0 : index
    %c0_9 = arith.constant 0 : index
    %11 = vector.load %arg3[%c2, %c0_8, %c0_9] : memref<3x4x128xf32, #tpu.memory_space<vmem>>, vector<1x4x128xf32>
    %12 = vector.shape_cast %11 : vector<1x4x128xf32> to vector<4x128xf32>
    %cst_10 = arith.constant dense<0.000000e+00> : vector<16x128xf32>
    %13 = tpu.matmul %3, %12, %cst_10 {dimension_numbers = #tpu.dot_dimension_numbers<[1], [0], [0], [1], [0, 0, 1, 1], [], []>} : vector<16x4xf32>, vector<4x128xf32>, vector<16x128xf32> -> vector<16x128xf32>
    %14 = arith.addf %10, %13 : vector<16x128xf32>
    %c0_11 = arith.constant 0 : index
    %c0_12 = arith.constant 0 : index
    %15 = vector.load %arg4[%c0_11, %c0_12] : memref<16x128xf32, #tpu.memory_space<vmem>>, vector<16x128xf32>
    %16 = arith.addf %14, %15 : vector<16x128xf32>
    %c0_13 = arith.constant 0 : index
    %c0_14 = arith.constant 0 : index
    %c0_15 = arith.constant 0 : index
    %17 = vector.load %arg5[%c0_13, %c0_14, %c0_15] : memref<1x16x128xf32, #tpu.memory_space<vmem>>, vector<1x16x128xf32>
    %18 = vector.shape_cast %17 : vector<1x16x128xf32> to vector<16x128xf32>
    %19 = vector.shape_cast %16 : vector<16x128xf32> to vector<1x16x128xf32>
    tpu.vector_store %arg5[%c0_13, %c0_14, %c0_15], %19 {strides = array<i32>} : memref<1x16x128xf32, #tpu.memory_space<vmem>>, vector<1x16x128xf32>,
    return
  }
  func.func @transform_0(%arg0: i32, %arg1: i32) -> (i32, i32, i32) {
    %c0_i32 = arith.constant 0 : i32
    %c0_i32_0 = arith.constant 0 : i32
    %c0_i32_1 = arith.constant 0 : i32
    return %arg1, %c0_i32, %c0_i32_0 : i32, i32, i32
  }
  func.func @transform_1(%arg0: i32, %arg1: i32) -> (i32, i32, i32) {
    %c0_i32 = arith.constant 0 : i32
    %c0_i32_0 = arith.constant 0 : i32
    %c0_i32_1 = arith.constant 0 : i32
    return %c0_i32, %c0_i32_0, %arg0 : i32, i32, i32
  }
  func.func @transform_2(%arg0: i32, %arg1: i32) -> (i32, i32) {
    %c0_i32 = arith.constant 0 : i32
    %c0_i32_0 = arith.constant 0 : i32
    return %c0_i32, %arg0 : i32, i32
  }
  func.func @transform_3(%arg0: i32, %arg1: i32) -> (i32, i32, i32) {
    %c0_i32 = arith.constant 0 : i32
    %c0_i32_0 = arith.constant 0 : i32
    return %arg1, %c0_i32, %arg0 : i32, i32, i32
  }
}

</mosaic_0001>

<bundles_post_ra>
// kernel: tpu_custom_call.1
= control target key start
LH: loop header
LB: loop body
LE: loop exit
PB: predicated region body
PF: predicated region fallthrough
CT: control target
= control target key end

     0   :  { %8 = vsyncpa [#allocation3], 0  ;;  %s761_s0 = inlined_call_operand.vmem [shape: f32[2,16,4], index: 0, kind: input, shape index: {}]   ;;  %s762_s1 = inlined_call_operand.vmem [shape: f32[3,4,128], index: 1, kind: input, shape index: {}]   ;;  %s763_s2 = inlined_call_operand.vmem [shape: f32[16,128], index: 2, kind: input, shape index: {}]   ;;  %s764_s3 = inlined_call_operand.hbm [shape: f32[2,16,128], index: 3, kind: output, shape index: {}]  }
   0x1   :  { %10 = vsyncpa [#allocation3 + $0x1], 0  ;;  %s649_s12 = smov 0   ;;  %s651_s13 = smov 0  }
   0x2   :  { %s653_s14 = smov 0   ;;  %s655_s15 = smov 0  }
   0x3   :  { %s657_s16 = smov 0   ;;  %s659_s17 = smov 0  }
   0x4 LB: > { %s461_s18 = sadd.s32 4294967295, %s625_s17   ;;  %s462_s19 = sadd.s32 4294967294, %s625_s17   ;;  %s625_s17 = sphi %s659_s17, %s16_s17   ;;  %s621_s16 = sphi %s657_s16, %s771_s16   ;;  %s617_s15 = sphi %s655_s15, %s770_s15   ;;  %s613_s14 = sphi %s653_s14, %s769_s14   ;;  %s609_s13 = sphi %s651_s13, %s768_s13   ;;  %s605_s12 = sphi %s649_s12, %s767_s12  }
   0x5   : > { %s25_s20 = sadd.s32 1, %s621_s16  ;;  %s115_s21 = sadd.s32 1, %s613_s14 }
   0x6   : > { %p26_p0 = scmp.ge.s32.totalorder %s25_s20, 2  ;;  %p125_p1 = scmp.ne.s32.totalorder %s613_s14, %s609_s13 }
   0x7   : > { %p126_p2 = scmp.eq.s32.totalorder %s461_s18, 1  ;;  %p131_p3 = scmp.ne.s32.totalorder %s609_s13, %s605_s12 }
   0x8   : > { %s773_s20 = smov (%p26_p0, %s25_s20), 0  ;;  %p132_p5 = scmp.eq.s32.totalorder %s462_s19, 1 }
   0x9   : > { %p689_p4 = por %p126_p2, %p125_p1  ;;  %s110_s23 = ssub.s32 %s621_s16, %s773_s20 }
   0xa   : > { %p467_p6 = scmp.ge.s32.totalorder %s625_s17, 1  ;;  %p113_p7 = scmp.eq.s32.totalorder %s110_s23, 0 }
   0xb   : > { %p696_p8 = por %p132_p5, %p131_p3  ;;  %p172_p9 = scmp.lt.s32.totalorder %s625_s17, 3 }
   0xc   : > { %s702_s25 = scalar_select %p113_p7, %s613_s14, %s115_s21  }
   0xd   : > { %p173_p10 = pnand %p467_p6, %p172_p9 }
   0xe   : > { %p204_p11 = scmp.lt.s32.totalorder (!%p173_p10), %s617_s15, 1  ;;  %s201_s10 = sand.u32 (!%p173_p10), 1, %s609_s13  }
   0xf   : > { %176 = sbr.rel (%p173_p10) target bundleno = 176 (0xb0), region = 32  ;;  %s468_s11 = sshll.u32 (!%p173_p10), %s201_s10, 4 }
  0x10   : > { %s488_s21 = sshll.u32 (!%p173_p10), %s617_s15, 4  ;;  %s203_s28 = scalar_lea.vmem (!%p173_p10), [#allocation2], %s468_s11 }
  0x11   : > { %s355_s27 = scalar_lea.hbm (!%p173_p10), %s764_s3, %s488_s21  ;;  %s356_s29 = sshll.u32 (!%p173_p10), %s203_s28, 4  ;;  %s357_s29 = int_to_ptr.vmem [resolvable:$true] %s356_s29 }
  0x12   : > { %s358_s30 = sshll.u32 (!%p173_p10), %s355_s27, 4  ;;  %s567_s11 = scalar_lea.hbm (!%p173_p10), %s764_s3, 32  ;;  %s359_s30 = int_to_ptr.hbm [resolvable:$true] %s358_s30 }
  0x14   : > { %vm241_vm0 = vcmask 1043456   ;;  %v478_v0 = vld [vmem:[%s762_s1 + $0x8] sm:$0xf]  ;;  %v221_v1 = vlaneseq  ;;  %v471_v2 = vld [vmem:[%s762_s1 + $0x4] sm:$0xf]  ;;  %s205_s5 = scalar_select %p204_p11, %s617_s15, 1 }
  0x15   : > { %479 = vmatpush.msk.msra.mxu2 %vm241_vm0, %v478_v0  ;;  %v231_v3 = vld [vmem:[%s762_s1] sm:$0xf]  ;;  %472 = vmatpush.msk.msra.mxu0 %vm241_vm0, %v471_v2  ;;  %vm234_vm2 = vcmask 31744   ;;  %v337_v26 = vld [vmem:[%s763_s2 + $0x8] sm:$0xff]  ;;  %s343_s15 = scalar_lea.sflag [#allocation3], %s201_s10 }
  0x16   : > { %v222_v4 = vshrl.u32 %v221_v1, 7  ;;  %475 = vmatpush.msk.msra.mxu1 %vm241_vm0, %v231_v3  ;;  %489 = vmatpush.msk.msra.mxu3 %vm241_vm0, %v471_v2  ;;  %s487_s6 = sshll.u32 %s205_s5, 4  ;;  %v336_v19 = vld [vmem:[%s763_s2] sm:$0xff] }
  0x17   : > { %s208_s9 = scalar_lea.vmem %s761_s0, %s487_s6  ;;  %s561_s6 = sshra.s32 %s359_s30, 4  ;;  %s562_s6 = int_to_ptr.hbm [resolvable:$true] %s561_s6 }
  0x18   : > { %v217_v5 = vld [vmem:[%s208_s9] sm:$0xff]  ;;  %v218_v6 = vld [vmem:[%s208_s9 + $0x8] sm:$0xff]  ;;  %vm228_vm1 = vcmp.lt.s32.totalorder %v222_v4, 7  ;;  %vm223_vm3 = vcmp.lt.s32.totalorder %v222_v4, 1  ;;  %s563_s7 = scalar_lea.hbm %s562_s6, 16  ;;  %p568_p1 = scmp.lt.s32.totalorder %s562_s6, %s764_s3 }
  0x19   : > { %v226_v7 = vrot.slane %v217_v5, 1  ;;  %v227_v8 = vrot.slane %v218_v6, 1  ;;  %473 = vmatmul.msk.f32.vlgmr.msra.gmra.mxu0 %vm234_vm2, %v217_v5  ;;  %v219_v9 = vrot.slane %v217_v5, 7  ;;  %v220_v10 = vrot.slane %v218_v6, 7  ;;  %474 = vmatmul.msk.f32.vlgmr.msra.gmra.mxu3 %vm234_vm2, %v218_v6  ;;  %p564_p12 = scmp.ne.s32.totalorder %s562_s6, %s563_s7  ;;  %p569_p2 = scmp.lt.s32.totalorder %s567_s11, %s563_s7 }
  0x1b   : > { %v229_v11 = vsel %vm228_vm1, %v226_v7, %v227_v8  ;;  %v225_v12 = vsel %vm223_vm3, %v220_v10, %v219_v9  ;;  %v230_v13 = vsel %vm228_vm1, %v227_v8, %v226_v7  ;;  %v224_v14 = vsel %vm223_vm3, %v219_v9, %v220_v10  ;;  %p565_p13 = pnand %p564_p12, %p689_p4  ;;  %p570_p3 = por %p569_p2, %p568_p1 }
  0x1c   : > { %480 = vmatmul.msk.f32.vlgmr.msra.gmra.mxu2 %vm234_vm2, %v229_v11  ;;  %476 = vmatmul.msk.f32.vlgmr.msra.gmra.mxu1 %vm234_vm2, %v225_v12 }
  0x1d   : > { %p566_p0 = pneg %p565_p13 }
  0x1f   : > { %p571_p5 = pnand %p570_p3, %p566_p0 }
  0x24   : > { %481 = vmatmul.msk.f32.gmra.mxu2 %vm234_vm2, %v230_v13  ;;  %477 = vmatmul.msk.f32.gmra.mxu1 %vm234_vm2, %v224_v14 }
  0x96   : > { %v262_v15 = vpop.f32.mrf.mxu0 }
  0x99   : > { %v294_v16 = vpop.f32.mrf.mxu1 }
  0x9a   : > { %v295_v17 = vadd.f32 %v294_v16, %v262_v15 }
  0x9c   : > { %v265_v21 = vpop.f32.mrf.mxu3 }
  0x9f   : > { %v328_v18 = vpop.f32.mrf.mxu2 }
  0xa0   : > { %v334_v20 = vadd.f32 %v328_v18, %v295_v17 }
  0xa1   : > { %v297_v22 = vpop.f32.mrf.mxu1 }
  0xa2   : > { %v338_v23 = vadd.f32 %v336_v19, %v334_v20  ;;  %v298_v24 = vadd.f32 %v297_v22, %v265_v21 }
  0xa4   : > { %340 = vst [vmem:[%s203_s28] sm:$0xff] %v338_v23 }
  0xa7   : > { %v331_v25 = vpop.f32.mrf.mxu2 }
  0xa8   : > { %v335_v27 = vadd.f32 %v331_v25, %v298_v24 }
  0xaa   : > { %v339_v28 = vadd.f32 %v337_v26, %v335_v27 }
  0xac   : > { %341 = vst [vmem:[%s203_s28 + $0x8] sm:$0xff] %v339_v28 }
  0xad   : > { %574 = shalt.err (!%p571_p5)
}
  0xae   : > { %s627_s10 = smov 128   ;;  %s628_s21 = smov 8  }
  0xaf   : > { %490 = dma.vmem_to_hbm [thread:$0]  (%p689_p4), %s357_s29, 256, %s359_s30, %s343_s15, %s627_s10, %s627_s10, %s628_s21  }
  0xb0 PF: > { %p496_p6 = scmp.ge.s32.totalorder %s625_s17, 2  ;;  %s373_s23 = sand.u32 1, %s605_s12  }
  0xb1   : > { %s374_s26 = scalar_lea.sflag [#allocation3], %s373_s23 }
  0xb2   : > { %p493_p7 = pnand %p496_p6, %p696_p8 }
  0xb4   : > { %p494_p9 = pneg %p493_p7 }
  0xb6   : > { %600 = dma.done.wait (%p494_p9), %s374_s26, 256  }
  0xb7   : > { %602 = vsyncadd (%p494_p9), %s374_s26, 4294967040  ;;  %s16_s17 = sadd.s32 1, %s625_s17   ;;  %s767_s12 = smov %s609_s13 }
  0xb8   : > { %p13_p10 = scmp.ge.s32.totalorder %s16_s17, 4   ;;  %s768_s13 = smov %s613_s14 }
  0xb9   : > { %s769_s14 = smov %s702_s25  ;;  %s770_s15 = smov %s621_s16 }
  0xba   : > { %s771_s16 = smov %s773_s20  ;;  %15 = sbr.rel (!%p13_p10) target bundleno = 4 (0x4), region = 75 }
  0xbf   :  { %380 = vsyncpa [#allocation3], 1 }
  0xc0   :  { %382 = vsyncpa [#allocation3 + $0x1], 1 }

</bundles_post_ra>
